<compile_context>
chip_gen: v6e
topology: v6e:2x2x1
jax: 0.10.0
libtpu: 0.0.40
codegen_flags: <defaults>
</compile_context>

<pallas_src>
import jax
import jax.numpy as jnp
import numpy as np
from jax import lax
from jax.experimental import pallas as pl
from jax.experimental.pallas import tpu as pltpu


def gat_gate_kernel(x_ref, adj_ref, wt_ref, bw_ref, asym_ref,
                    wgx_ref, wgh_ref, bg_ref, out_ref):
    x   = x_ref[...]      # (S, F)   S = block_b * N node-rows for this grid step
    adj = adj_ref[...]    # (S, S)   block-diagonal {0,1} adjacency (+ self loops)
    wt  = wt_ref[...]     # (F, F)   == W.weight.T
    bw  = bw_ref[...]     # (1, F)
    As  = asym_ref[...]   # (F, F)   == A + A.T  (folds e + e.T)
    wgx = wgx_ref[...]    # (1, F)   gate weights acting on x
    wgh = wgh_ref[...]    # (1, F)   gate weights acting on h_prime
    bg  = bg_ref[...]     # (1, 1)

    # h = W(x) and hA = h @ (A + A^T): dense slab matmuls on the MXU.
    # TODO(synk): bf16 MXU operands (f32 accumulate) give ~3x MXU throughput, but
    # the compounded error exceeds the 2e-3 accuracy tolerance at these
    # magnitudes and this size is latency-bound anyway, so operands stay f32.
    h  = jnp.dot(x, wt, preferred_element_type=jnp.float32) + bw        # (S, F)
    hA = jnp.dot(h, As, preferred_element_type=jnp.float32)             # (S, F)

    # e = hA @ h^T over the whole slab (== e + e^T of the torch code per graph);
    # cross-graph entries are garbage but are masked out just below.
    e = lax.dot_general(hA, h, (((1,), (1,)), ((), ())),
                        preferred_element_type=jnp.float32)             # (S, S)

    # Masked softmax over neighbors.  Masked entries get -9e15 whose exp
    # underflows to exactly 0 in f32, so the reference's trailing `att * adj`
    # is redundant.  Self-loops guarantee >=1 unmasked entry per row, so the
    # denominator is never zero.  Exact divide (approx reciprocal previously
    # broke the 2e-3 tolerance).
    e_m = jnp.where(adj > 0.0, e, jnp.full_like(e, -9.0e15))
    m   = jnp.max(e_m, axis=-1, keepdims=True)
    p   = jnp.exp(e_m - m)
    att = p / jnp.sum(p, axis=-1, keepdims=True)                        # (S, S)

    # h_prime = relu(att @ h): one dense (S,S)@(S,F) matmul; the zero
    # off-diagonal attention entries contribute exact zeros.
    h_prime = jnp.maximum(
        jnp.dot(att, h, preferred_element_type=jnp.float32), 0.0)       # (S, F)

    # Gate: sigmoid(<x, wgx> + <h_prime, wgh> + bg), fused into one VPU
    # multiply-add and a single cross-lane reduction.
    z = jnp.sum(x * wgx + h_prime * wgh, axis=-1, keepdims=True) + bg   # (S, 1)
    coeff = jax.nn.sigmoid(z)

    # coeff * x + (1 - coeff) * h_prime with one fewer multiply.
    out_ref[...] = h_prime + coeff * (x - h_prime)


def build_batched_adj(edge_index, n_nodes):
    """edge_index: (B, 2, E) int32 -> dense (B, N, N) {0,1} adjacency + self-loops."""
    b = edge_index.shape[0]
    adj = jnp.zeros((b, n_nodes, n_nodes), jnp.float32)
    b_idx = jnp.arange(b)[:, None]
    adj = adj.at[b_idx, edge_index[:, 0, :], edge_index[:, 1, :]].set(1.0)
    diag = jnp.arange(n_nodes)
    adj = adj.at[:, diag, diag].set(1.0)
    return adj


def _num_parallel_steps():
    """2 parallel grid steps on v7x (2 TensorCores per chip), else 1 (single TC)."""
    try:
        kind = jax.devices()[0].device_kind.lower()
    except Exception:
        return 1
    return 2 if ("v7" in kind or "7x" in kind) else 1


def gat_gate(x, edge_index, params, *, block_b=None):
    """x: (B, N, F) f32, edge_index: (B, 2, E) int32.  Requires F_in == F_out."""
    B, N, F = x.shape
    if block_b is None:
        steps = _num_parallel_steps()
        block_b = B // steps if (B % steps == 0) else B
    assert B % block_b == 0, "batch must be divisible by the per-step graph block"
    G = B // block_b          # number of grid steps (1 on v5e/v6e, 2 on v7x)
    S = block_b * N           # node-rows handled per grid step
    # VMEM guard (v7x): the (S,S) f32 score slab dominates if this kernel is
    # reused at larger N/block_b -- keep S <= ~1024 on v7x (64 MiB VMEM) /
    # ~2048 on v5e/v6e, or raise vmem_limit_bytes via pltpu.CompilerParams.

    # ---- host/XLA-side glue (once): flat slab, block-diag adjacency, params ----
    x2    = x.reshape(B * N, F)                    # host-side reshape is free
    adj   = build_batched_adj(edge_index, N)       # (B, N, N)
    adj_g = adj.reshape(G, block_b, N, N)
    adj_bd = jnp.einsum('gbij,bc->gbicj', adj_g,
                        jnp.eye(block_b, dtype=adj.dtype)).reshape(G, S, S)
    wt    = params["W_w"].T                        # (F, F)
    bw    = params["W_b"].reshape(1, F)            # (1, F)
    a_sym = params["A"] + params["A"].T            # folds e + e.T into one matmul
    wgx   = params["gate_w"][:, :F].reshape(1, F)  # gate weights on x part of concat
    wgh   = params["gate_w"][:, F:].reshape(1, F)  # gate weights on h_prime part
    bg    = params["gate_b"].reshape(1, 1)         # (1, 1)

    def resident(shape):
        # Whole array, same block index every grid step -> stays resident in VMEM.
        return pl.BlockSpec(shape, lambda g: (0,) * len(shape))

    out2 = pl.pallas_call(
        gat_gate_kernel,
        out_shape=jax.ShapeDtypeStruct((B * N, F), jnp.float32),
        grid_spec=pltpu.PrefetchScalarGridSpec(
            num_scalar_prefetch=0,
            grid=(G,),
            in_specs=[
                pl.BlockSpec((S, F), lambda g: (g, 0)),           # x slab
                pl.BlockSpec((None, S, S), lambda g: (g, 0, 0)),  # block-diag adj
                resident((F, F)),                                 # W^T
                resident((1, F)),                                 # W bias
                resident((F, F)),                                 # A + A^T
                resident((1, F)),                                 # gate w (x)
                resident((1, F)),                                 # gate w (h')
                resident((1, 1)),                                 # gate bias
            ],
            out_specs=pl.BlockSpec((S, F), lambda g: (g, 0)),
        ),
        compiler_params=pltpu.CompilerParams(
            dimension_semantics=("parallel",),   # v7x: shard the 2 steps across 2 TCs
        ),
    )(x2, adj_bd, wt, bw, a_sym, wgx, wgh, bg)

    return out2.reshape(B, N, F)


def gat_gate_ref(x, edge_index, params):
    """Pure-JAX reference mirroring the PyTorch forward, vmapped over graphs."""
    N = x.shape[1]
    adj = build_batched_adj(edge_index, N)

    def single(xg, adjg):
        h = xg @ params["W_w"].T + params["W_b"]
        e = (h @ params["A"]) @ h.T
        e = e + e.T
        att = jnp.where(adjg > 0, e, jnp.full_like(e, -9.0e15))
        att = jax.nn.softmax(att, axis=1) * adjg
        h_prime = jax.nn.relu(att @ h)
        z = jnp.concatenate([xg, h_prime], -1) @ params["gate_w"].T + params["gate_b"]
        coeff = jax.nn.sigmoid(z)
        return coeff * xg + (1.0 - coeff) * h_prime

    return jax.vmap(single)(x, adj)


if __name__ == "__main__":
    # Small batched problem: 8 graphs, 16 nodes, 32 features (F_in == F_out,
    # required by the gated residual), 24 directed edges per graph.
    B, N, F, E = 8, 16, 32, 24
    key = jax.random.PRNGKey(0)
    kx, ke, k1, k2, k3, k4, k5 = jax.random.split(key, 7)

    x = jax.random.normal(kx, (B, N, F), dtype=jnp.float32)
    edge_index = jax.random.randint(ke, (B, 2, E), 0, N, dtype=jnp.int32)

    # Deterministic synthetic parameters (shapes follow the module __init__).
    params = {
        "W_w":    0.1 * jax.random.normal(k1, (F, F), dtype=jnp.float32),      # nn.Linear(F, F).weight
        "W_b":    0.1 * jax.random.normal(k2, (F,),   dtype=jnp.float32),      # nn.Linear(F, F).bias
        "A":      0.1 * jax.random.normal(k3, (F, F), dtype=jnp.float32),      # nn.Parameter
        "gate_w": 0.1 * jax.random.normal(k4, (1, 2 * F), dtype=jnp.float32),  # nn.Linear(2F, 1).weight
        "gate_b": 0.1 * jax.random.normal(k5, (1,),   dtype=jnp.float32),      # nn.Linear(2F, 1).bias
    }

    ref = gat_gate_ref(x, edge_index, params)

    # Default blocking (1 step on v5e/v6e, 2 parallel steps on v7x).
    out = jax.block_until_ready(gat_gate(x, edge_index, params))
    np.testing.assert_allclose(np.asarray(out), np.asarray(ref), rtol=2e-3, atol=2e-3)

    # Also validate the explicit 2-step (v7x-style) blocking regardless of chip.
    out2 = jax.block_until_ready(gat_gate(x, edge_index, params, block_b=B // 2))
    np.testing.assert_allclose(np.asarray(out2), np.asarray(ref), rtol=2e-3, atol=2e-3)

    print("KERNEL_OK")
</pallas_src>

<mosaic_0001>
module attributes {stable_mosaic.version = 11 : i64} {
  func.func @gat_gate_kernel(%arg0: i32, %arg1: memref<128x32xf32, #tpu.memory_space<vmem>>, %arg2: memref<1x128x128xf32, #tpu.memory_space<vmem>>, %arg3: memref<32x32xf32, #tpu.memory_space<vmem>>, %arg4: memref<1x32xf32, #tpu.memory_space<vmem>>, %arg5: memref<32x32xf32, #tpu.memory_space<vmem>>, %arg6: memref<1x32xf32, #tpu.memory_space<vmem>>, %arg7: memref<1x32xf32, #tpu.memory_space<vmem>>, %arg8: memref<1x1xf32, #tpu.memory_space<vmem>>, %arg9: memref<128x32xf32, #tpu.memory_space<vmem>>) attributes {dimension_semantics = [#tpu.dimension_semantics<parallel>], iteration_bounds = array<i64: 1>, scalar_prefetch = 0 : i64, scratch_operands = 0 : i64, tpu.core_type = #tpu.core_type<tc>, window_params = [{transform_indices = @transform_0, window_bounds = array<i64: 128, 32>}, {transform_indices = @transform_1, window_bounds = array<i64: 1, 128, 128>}, {pipeline_mode = #tpu.pipeline_mode<synchronous>, transform_indices = @transform_2, window_bounds = array<i64: 32, 32>}, {pipeline_mode = #tpu.pipeline_mode<synchronous>, transform_indices = @transform_3, window_bounds = array<i64: 1, 32>}, {pipeline_mode = #tpu.pipeline_mode<synchronous>, transform_indices = @transform_4, window_bounds = array<i64: 32, 32>}, {pipeline_mode = #tpu.pipeline_mode<synchronous>, transform_indices = @transform_5, window_bounds = array<i64: 1, 32>}, {pipeline_mode = #tpu.pipeline_mode<synchronous>, transform_indices = @transform_6, window_bounds = array<i64: 1, 32>}, {pipeline_mode = #tpu.pipeline_mode<synchronous>, transform_indices = @transform_7, window_bounds = array<i64: 1, 1>}, {transform_indices = @transform_8, window_bounds = array<i64: 128, 32>}]} {
    %c0 = arith.constant 0 : index
    %c0_0 = arith.constant 0 : index
    %0 = vector.load %arg1[%c0, %c0_0] : memref<128x32xf32, #tpu.memory_space<vmem>>, vector<128x32xf32>
    %c0_1 = arith.constant 0 : index
    %c0_2 = arith.constant 0 : index
    %c0_3 = arith.constant 0 : index
    %1 = vector.load %arg2[%c0_1, %c0_2, %c0_3] : memref<1x128x128xf32, #tpu.memory_space<vmem>>, vector<1x128x128xf32>
    %2 = vector.shape_cast %1 : vector<1x128x128xf32> to vector<128x128xf32>
    %c0_4 = arith.constant 0 : index
    %c0_5 = arith.constant 0 : index
    %3 = vector.load %arg3[%c0_4, %c0_5] : memref<32x32xf32, #tpu.memory_space<vmem>>, vector<32x32xf32>
    %c0_6 = arith.constant 0 : index
    %c0_7 = arith.constant 0 : index
    %4 = vector.load %arg4[%c0_6, %c0_7] : memref<1x32xf32, #tpu.memory_space<vmem>>, vector<1x32xf32>
    %c0_8 = arith.constant 0 : index
    %c0_9 = arith.constant 0 : index
    %5 = vector.load %arg5[%c0_8, %c0_9] : memref<32x32xf32, #tpu.memory_space<vmem>>, vector<32x32xf32>
    %c0_10 = arith.constant 0 : index
    %c0_11 = arith.constant 0 : index
    %6 = vector.load %arg6[%c0_10, %c0_11] : memref<1x32xf32, #tpu.memory_space<vmem>>, vector<1x32xf32>
    %c0_12 = arith.constant 0 : index
    %c0_13 = arith.constant 0 : index
    %7 = vector.load %arg7[%c0_12, %c0_13] : memref<1x32xf32, #tpu.memory_space<vmem>>, vector<1x32xf32>
    %c0_14 = arith.constant 0 : index
    %c0_15 = arith.constant 0 : index
    %8 = vector.load %arg8[%c0_14, %c0_15] : memref<1x1xf32, #tpu.memory_space<vmem>>, vector<1x1xf32>
    %cst = arith.constant dense<0.000000e+00> : vector<128x32xf32>
    %9 = tpu.matmul %0, %3, %cst {dimension_numbers = #tpu.dot_dimension_numbers<[1], [0], [0], [1], [0, 0, 1, 1], [], []>} : vector<128x32xf32>, vector<32x32xf32>, vector<128x32xf32> -> vector<128x32xf32>
    %10 = vector.broadcast %4 : vector<1x32xf32> to vector<128x32xf32>
    %11 = arith.addf %9, %10 : vector<128x32xf32>
    %cst_16 = arith.constant dense<0.000000e+00> : vector<128x32xf32>
    %12 = tpu.matmul %11, %5, %cst_16 {dimension_numbers = #tpu.dot_dimension_numbers<[1], [0], [0], [1], [0, 0, 1, 1], [], []>} : vector<128x32xf32>, vector<32x32xf32>, vector<128x32xf32> -> vector<128x32xf32>
    %cst_17 = arith.constant dense<0.000000e+00> : vector<128x128xf32>
    %13 = tpu.matmul %12, %11, %cst_17 {dimension_numbers = #tpu.dot_dimension_numbers<[1], [1], [0], [0], [0, 0, 1, 0], [], []>} : vector<128x32xf32>, vector<128x32xf32>, vector<128x128xf32> -> vector<128x128xf32>
    %cst_18 = arith.constant 0.000000e+00 : f32
    %14 = vector.broadcast %cst_18 : f32 to vector<128x128xf32>
    %15 = arith.cmpf ogt, %2, %14 : vector<128x128xf32>
    %cst_19 = arith.constant -9.000000e+15 : f32
    %16 = vector.broadcast %cst_19 : f32 to vector<128x128xf32>
    %17 = arith.select %15, %13, %16 : vector<128x128xi1>, vector<128x128xf32>
    %cst_20 = arith.constant dense<0xFF800000> : vector<128xf32>
    %18 = vector.multi_reduction <maximumf>, %17, %cst_20 [1] : vector<128x128xf32> to vector<128xf32>
    %19 = vector.shape_cast %18 : vector<128xf32> to vector<128x1xf32>
    %20 = vector.broadcast %19 : vector<128x1xf32> to vector<128x128xf32>
    %21 = arith.subf %17, %20 : vector<128x128xf32>
    %22 = math.exp %21 : vector<128x128xf32>
    %cst_21 = arith.constant dense<0.000000e+00> : vector<128xf32>
    %23 = vector.multi_reduction <add>, %22, %cst_21 [1] : vector<128x128xf32> to vector<128xf32>
    %24 = vector.shape_cast %23 : vector<128xf32> to vector<128x1xf32>
    %25 = vector.broadcast %24 : vector<128x1xf32> to vector<128x128xf32>
    %26 = arith.divf %22, %25 : vector<128x128xf32>
    %cst_22 = arith.constant dense<0.000000e+00> : vector<128x32xf32>
    %27 = tpu.matmul %26, %11, %cst_22 {dimension_numbers = #tpu.dot_dimension_numbers<[1], [0], [0], [1], [0, 0, 1, 1], [], []>} : vector<128x128xf32>, vector<128x32xf32>, vector<128x32xf32> -> vector<128x32xf32>
    %cst_23 = arith.constant 0.000000e+00 : f32
    %28 = vector.broadcast %cst_23 : f32 to vector<128x32xf32>
    %29 = arith.maximumf %27, %28 : vector<128x32xf32>
    %30 = vector.broadcast %6 : vector<1x32xf32> to vector<128x32xf32>
    %31 = arith.mulf %0, %30 : vector<128x32xf32>
    %32 = vector.broadcast %7 : vector<1x32xf32> to vector<128x32xf32>
    %33 = arith.mulf %29, %32 : vector<128x32xf32>
    %34 = arith.addf %31, %33 : vector<128x32xf32>
    %cst_24 = arith.constant dense<0.000000e+00> : vector<128xf32>
    %35 = vector.multi_reduction <add>, %34, %cst_24 [1] : vector<128x32xf32> to vector<128xf32>
    %36 = vector.shape_cast %35 : vector<128xf32> to vector<128x1xf32>
    %37 = vector.broadcast %8 : vector<1x1xf32> to vector<128x1xf32>
    %38 = arith.addf %36, %37 : vector<128x1xf32>
    %39 = arith.negf %38 : vector<128x1xf32>
    %40 = math.exp %39 : vector<128x1xf32>
    %cst_25 = arith.constant 1.000000e+00 : f32
    %41 = vector.broadcast %cst_25 : f32 to vector<128x1xf32>
    %42 = arith.addf %41, %40 : vector<128x1xf32>
    %43 = arith.divf %41, %42 : vector<128x1xf32>
    %44 = arith.subf %0, %29 : vector<128x32xf32>
    %45 = vector.broadcast %43 : vector<128x1xf32> to vector<128x32xf32>
    %46 = arith.mulf %45, %44 : vector<128x32xf32>
    %47 = arith.addf %29, %46 : vector<128x32xf32>
    %c0_26 = arith.constant 0 : index
    %c0_27 = arith.constant 0 : index
    %48 = vector.load %arg9[%c0_26, %c0_27] : memref<128x32xf32, #tpu.memory_space<vmem>>, vector<128x32xf32>
    tpu.vector_store %arg9[%c0_26, %c0_27], %47 {strides = array<i32>} : memref<128x32xf32, #tpu.memory_space<vmem>>, vector<128x32xf32>,
    return
  }
  func.func @transform_0(%arg0: i32) -> (i32, i32) {
    %c0_i32 = arith.constant 0 : i32
    %c0_i32_0 = arith.constant 0 : i32
    return %arg0, %c0_i32 : i32, i32
  }
  func.func @transform_1(%arg0: i32) -> (i32, i32, i32) {
    %c0_i32 = arith.constant 0 : i32
    %c0_i32_0 = arith.constant 0 : i32
    %c0_i32_1 = arith.constant 0 : i32
    return %arg0, %c0_i32, %c0_i32_0 : i32, i32, i32
  }
  func.func @transform_2(%arg0: i32) -> (i32, i32) {
    %c0_i32 = arith.constant 0 : i32
    %c0_i32_0 = arith.constant 0 : i32
    %c0_i32_1 = arith.constant 0 : i32
    return %c0_i32, %c0_i32_0 : i32, i32
  }
  func.func @transform_3(%arg0: i32) -> (i32, i32) {
    %c0_i32 = arith.constant 0 : i32
    %c0_i32_0 = arith.constant 0 : i32
    %c0_i32_1 = arith.constant 0 : i32
    return %c0_i32, %c0_i32_0 : i32, i32
  }
  func.func @transform_4(%arg0: i32) -> (i32, i32) {
    %c0_i32 = arith.constant 0 : i32
    %c0_i32_0 = arith.constant 0 : i32
    %c0_i32_1 = arith.constant 0 : i32
    return %c0_i32, %c0_i32_0 : i32, i32
  }
  func.func @transform_5(%arg0: i32) -> (i32, i32) {
    %c0_i32 = arith.constant 0 : i32
    %c0_i32_0 = arith.constant 0 : i32
    %c0_i32_1 = arith.constant 0 : i32
    return %c0_i32, %c0_i32_0 : i32, i32
  }
  func.func @transform_6(%arg0: i32) -> (i32, i32) {
    %c0_i32 = arith.constant 0 : i32
    %c0_i32_0 = arith.constant 0 : i32
    %c0_i32_1 = arith.constant 0 : i32
    return %c0_i32, %c0_i32_0 : i32, i32
  }
  func.func @transform_7(%arg0: i32) -> (i32, i32) {
    %c0_i32 = arith.constant 0 : i32
    %c0_i32_0 = arith.constant 0 : i32
    %c0_i32_1 = arith.constant 0 : i32
    return %c0_i32, %c0_i32_0 : i32, i32
  }
  func.func @transform_8(%arg0: i32) -> (i32, i32) {
    %c0_i32 = arith.constant 0 : i32
    %c0_i32_0 = arith.constant 0 : i32
    return %arg0, %c0_i32 : i32, i32
  }
}

</mosaic_0001>

<bundles_post_ra>
// kernel: tpu_custom_call.1
= control target key start
LH: loop header
LB: loop body
LE: loop exit
PB: predicated region body
PF: predicated region fallthrough
CT: control target
= control target key end

     0   :  { %s2692_s0 = inlined_call_operand.vmem [shape: f32[128,32], index: 0, kind: input, shape index: {}]   ;;  %s2693_s1 = inlined_call_operand.vmem [shape: f32[1,128,128], index: 1, kind: input, shape index: {}]   ;;  %s2694_s2 = inlined_call_operand.vmem [shape: f32[32,32], index: 2, kind: input, shape index: {}]   ;;  %s2695_s3 = inlined_call_operand.vmem [shape: f32[1,32], index: 3, kind: input, shape index: {}]   ;;  %s2696_s4 = inlined_call_operand.hbm [shape: f32[32,32], index: 4, kind: input, shape index: {}]   ;;  %s2697_s5 = inlined_call_operand.vmem [shape: f32[1,32], index: 5, kind: input, shape index: {}]   ;;  %s2698_s6 = inlined_call_operand.vmem [shape: f32[1,32], index: 6, kind: input, shape index: {}]   ;;  %s2699_s7 = inlined_call_operand.<no memory space> [shape: f32[1,1], index: 7, kind: input, shape index: {}]   ;;  %s2700_s8 = inlined_call_operand.vmem [shape: f32[128,32], index: 8, kind: output, shape index: {}]  }
   0x1   :  { %v13_v0 = vstv %s2699_s7 }
   0x2   :  { %14 = vst [vmem:[#allocation2] sm:$0x1] %v13_v0 }
   0x3   :  { %15 = vsyncpa [#allocation4], 0  ;;  %s1923_s29 = smov [#allocation3]  }
   0x4   :  { %s29_s30 = sshll.u32 %s1923_s29, 4  ;;  %s30_s30 = int_to_ptr.vmem [resolvable:$true] %s29_s30 }
   0x5   :  { %s1909_s9 = scalar_lea.vmem %s30_s30, 512  ;;  %p1914_p1 = scmp.lt.s32.totalorder %s30_s30, %s30_s30 }
   0x6   :  { %p1910_p0 = scmp.ne.s32.totalorder %s30_s30, %s1909_s9  ;;  %p1915_p2 = scmp.lt.s32.totalorder %s1909_s9, %s1909_s9 }
   0x8   :  { %p1916_p3 = por %p1915_p2, %p1914_p1 }
   0xa   :  { %p1917_p4 = pnand %p1916_p3, %p1910_p0 }
   0xc   :  { %1920 = shalt.err (!%p1917_p4)
}
   0xd   :  { %s1924_s10 = smov 128   ;;  %s1925_s11 = smov 8  }
   0xe   :  { %35 = dma.hbm_to_vmem [thread:$0]  %s2696_s4, 512, %s30_s30, [#allocation4], %s1924_s10, %s1924_s10, %s1925_s11  }
   0xf   :  { %1921 = dma.done.wait [#allocation4], 512  }
  0x10   :  { %1922 = vsyncadd [#allocation4], 4294966784  ;;  %vm95_vm0 = vcmask 261120   ;;  %v80_v1 = vld [vmem:[%s2694_s2 + $0x18] sm:$0xff]  ;;  %v79_v2 = vld [vmem:[%s2694_s2 + $0x10] sm:$0xff] }
  0x11   :  { %1575 = vmatprep.subr.mxu0 %v80_v1  ;;  %v1987_v3 = vld [vmem:[%s2692_s0] sm:$0xff]  ;;  %v78_v4 = vld [vmem:[%s2694_s2 + $0x8] sm:$0xff]  ;;  %v2005_v7 = vld [vmem:[%s2692_s0 + $0x10] sm:$0xff] }
  0x12   :  { %1576 = vmatpush3.msra.mxu0 %v80_v1  ;;  %1583 = vmatprep.mubr.msk.f32.mxu0 %vm95_vm0, %v1987_v3  ;;  %v77_v5 = vld [vmem:[%s2694_s2] sm:$0xff]  ;;  %v2000_v6 = vld [vmem:[%s2692_s0 + $0x8] sm:$0xff]  ;;  %v2014_v9 = vld [vmem:[%s2692_s0 + $0x18] sm:$0xff] }
  0x13   :  { %1577 = vmatprep.subr.mxu0 %v79_v2  ;;  %v85_v8 = vld [vmem:[#allocation3 + $0x18] sm:$0xff]  ;;  %v2028_v11 = vld [vmem:[%s2692_s0 + $0x28] sm:$0xff]  ;;  %v2033_v12 = vld [vmem:[%s2692_s0 + $0x30] sm:$0xff] }
  0x14   :  { %1578 = vmatpush3.msra.mxu0 %v79_v2  ;;  %1607 = vmatprep.subr.mxu1 %v85_v8  ;;  %v2019_v10 = vld [vmem:[%s2692_s0 + $0x20] sm:$0xff]  ;;  %v2042_v13 = vld [vmem:[%s2692_s0 + $0x38] sm:$0xff]  ;;  %v2056_v15 = vld [vmem:[%s2692_s0 + $0x48] sm:$0xff] }
  0x15   :  { %1579 = vmatprep.subr.mxu0 %v78_v4  ;;  %1608 = vmatpush3.msra.mxu1 %v85_v8  ;;  %v2047_v14 = vld [vmem:[%s2692_s0 + $0x40] sm:$0xff]  ;;  %v2061_v16 = vld [vmem:[%s2692_s0 + $0x50] sm:$0xff]  ;;  %v2070_v17 = vld [vmem:[%s2692_s0 + $0x58] sm:$0xff] }
  0x16   :  { %1580 = vmatpush3.msra.mxu0 %v78_v4  ;;  %v2075_v18 = vld [vmem:[%s2692_s0 + $0x60] sm:$0xff]  ;;  %v2084_v19 = vld [vmem:[%s2692_s0 + $0x68] sm:$0xff]  ;;  %v59_v20 = vld [vmem:[%s2692_s0 + $0x70] sm:$0xff] }
  0x17   :  { %1581 = vmatprep.subr.mxu0 %v77_v5  ;;  %v2095_v21 = vld [vmem:[%s2692_s0 + $0x78] sm:$0xff]  ;;  %v83_v23 = vld [vmem:[#allocation3 + $0x8] sm:$0xff]  ;;  %v82_v24 = vld [vmem:[#allocation3] sm:$0xff] }
  0x18   :  { %1582 = vmatpush3.msra.mxu0 %v77_v5  ;;  %v84_v22 = vld [vmem:[#allocation3 + $0x10] sm:$0xff]  ;;  %v1387_v26 = vld [vmem:[%s2695_s3] ss:$0 sm:$0xff] }
  0x19   :  { %1584 = vmatmul.mubr.msk.f32.vlgmr.msra.gmra.mxu0 %vm95_vm0, %v2000_v6  ;;  %1609 = vmatprep.subr.mxu1 %v84_v22 }
  0x1a   :  { %1586 = vmatprep.mubr.msk.f32.mxu0 %vm95_vm0, %v2005_v7  ;;  %1610 = vmatpush3.msra.mxu1 %v84_v22 }
  0x1b   :  { %1611 = vmatprep.subr.mxu1 %v83_v23 }
  0x1c   :  { %1612 = vmatpush3.msra.mxu1 %v83_v23 }
  0x1d   :  { %1587 = vmatmul.mubr.msk.f32.gmra.mxu0 %vm95_vm0, %v2014_v9  ;;  %1613 = vmatprep.subr.mxu1 %v82_v24 }
  0x1e   :  { %1589 = vmatprep.mubr.msk.f32.mxu0 %vm95_vm0, %v2019_v10  ;;  %1614 = vmatpush3.msra.mxu1 %v82_v24 }
  0x21   :  { %1590 = vmatmul.mubr.msk.f32.gmra.mxu0 %vm95_vm0, %v2028_v11 }
  0x22   :  { %1592 = vmatprep.mubr.msk.f32.mxu0 %vm95_vm0, %v2033_v12 }
  0x25   :  { %1593 = vmatmul.mubr.msk.f32.gmra.mxu0 %vm95_vm0, %v2042_v13 }
  0x26   :  { %1595 = vmatprep.mubr.msk.f32.mxu0 %vm95_vm0, %v2047_v14 }
  0x29   :  { %1596 = vmatmul.mubr.msk.f32.gmra.mxu0 %vm95_vm0, %v2056_v15 }
  0x2a   :  { %1598 = vmatprep.mubr.msk.f32.mxu0 %vm95_vm0, %v2061_v16 }
  0x2d   :  { %1599 = vmatmul.mubr.msk.f32.gmra.mxu0 %vm95_vm0, %v2070_v17 }
  0x2e   :  { %1601 = vmatprep.mubr.msk.f32.mxu0 %vm95_vm0, %v2075_v18 }
  0x31   :  { %1602 = vmatmul.mubr.msk.f32.gmra.mxu0 %vm95_vm0, %v2084_v19 }
  0x32   :  { %1604 = vmatprep.mubr.msk.f32.mxu0 %vm95_vm0, %v59_v20 }
  0x35   :  { %1605 = vmatmul.mubr.msk.f32.gmra.mxu0 %vm95_vm0, %v2095_v21 }
  0xd9   :  { %v1585_v25 = vpop.f32.mrf.mxu0 }
  0xda   :  { %v2104_v29 = vadd.f32 %v1585_v25, %v1387_v26  ;;  %v61_v25 = vld [vmem:[%s2693_s1] sm:$0xff] }
  0xdb   :  { %v210_v27 = vpop.f32.mrf.mxu0  ;;  %vm675_vm1 = vcmp.gt.f32.partialorder %v61_v25, 0.0 }
  0xdc   :  { %v2102_v28 = vadd.f32 %v1387_v26, %v210_v27  ;;  %v62_v27 = vld [vmem:[%s2693_s1 + $0x8] sm:$0xff] }
  0xdd   :  { %v1588_v30 = vpop.f32.mrf.mxu0  ;;  %vm676_vm2 = vcmp.gt.f32.partialorder %v62_v27, 0.0 }
  0xde   :  { %1615 = vmatprep.mubr.msk.f32.mxu1 %vm95_vm0, %v2102_v28  ;;  %v2112_v33 = vadd.f32 %v1588_v30, %v1387_v26 }
  0xdf   :  { %v220_v31 = vpop.f32.mrf.mxu0  ;;  %1616 = vmatmul.mubr.msk.f32.vlgmr.msra.gmra.mxu1 %vm95_vm0, %v2104_v29 }
  0xe0   :  { %v2110_v32 = vadd.f32 %v1387_v26, %v220_v31 }
  0xe1   :  { %v1591_v34 = vpop.f32.mrf.mxu0 }
  0xe2   :  { %1618 = vmatprep.mubr.msk.f32.mxu1 %vm95_vm0, %v2110_v32  ;;  %v2116_v35 = vadd.f32 %v1591_v34, %v1387_v26 }
  0xe3   :  { %v230_v36 = vpop.f32.mrf.mxu0  ;;  %1619 = vmatmul.mubr.msk.f32.gmra.mxu1 %vm95_vm0, %v2112_v33 }
  0xe4   :  { %v2120_v37 = vadd.f32 %v1387_v26, %v230_v36 }
  0xe5   :  { %v1594_v38 = vpop.f32.mrf.mxu0 }
  0xe6   :  { %1621 = vmatprep.mubr.msk.f32.mxu1 %vm95_vm0, %v2120_v37  ;;  %v2124_v39 = vadd.f32 %v1594_v38, %v1387_v26  ;;  %v66_v38 = vld [vmem:[%s2693_s1 + $0x28] sm:$0xff] }
  0xe7   :  { %v240_v40 = vpop.f32.mrf.mxu0  ;;  %1622 = vmatmul.mubr.msk.f32.gmra.mxu1 %vm95_vm0, %v2116_v35  ;;  %vm680_vm6 = vcmp.gt.f32.partialorder %v66_v38, 0.0 }
  0xe8   :  { %v2128_v41 = vadd.f32 %v1387_v26, %v240_v40 }
  0xe9   :  { %v1597_v42 = vpop.f32.mrf.mxu0 }
  0xea   :  { %1624 = vmatprep.mubr.msk.f32.mxu1 %vm95_vm0, %v2128_v41  ;;  %v256_v43 = vadd.f32 %v1597_v42, %v1387_v26 }
  0xeb   :  { %v250_v44 = vpop.f32.mrf.mxu0  ;;  %1625 = vmatmul.mubr.msk.f32.gmra.mxu1 %vm95_vm0, %v2124_v39 }
  0xec   :  { %v2134_v45 = vadd.f32 %v1387_v26, %v250_v44 }
  0xed   :  { %v1600_v46 = vpop.f32.mrf.mxu0 }
  0xee   :  { %1627 = vmatprep.mubr.msk.f32.mxu1 %vm95_vm0, %v2134_v45  ;;  %v266_v47 = vadd.f32 %v1600_v46, %v1387_v26 }
  0xef   :  { %v260_v48 = vpop.f32.mrf.mxu0  ;;  %1628 = vmatmul.mubr.msk.f32.gmra.mxu1 %vm95_vm0, %v256_v43 }
  0xf0   :  { %v261_v49 = vadd.f32 %v1387_v26, %v260_v48 }
  0xf1   :  { %v1603_v50 = vpop.f32.mrf.mxu0 }
  0xf2   :  { %1630 = vmatprep.mubr.msk.f32.mxu1 %vm95_vm0, %v261_v49  ;;  %v276_v51 = vadd.f32 %v1603_v50, %v1387_v26 }
  0xf3   :  { %v270_v52 = vpop.f32.mrf.mxu0  ;;  %1631 = vmatmul.mubr.msk.f32.gmra.mxu1 %vm95_vm0, %v266_v47 }
  0xf4   :  { %v271_v53 = vadd.f32 %v1387_v26, %v270_v52  ;;  %v71_v52 = vld [vmem:[%s2693_s1 + $0x50] sm:$0xff] }
  0xf5   :  { %v1606_v54 = vpop.f32.mrf.mxu0  ;;  %vm685_vm11 = vcmp.gt.f32.partialorder %v71_v52, 0.0 }
  0xf6   :  { %v286_v55 = vadd.f32 %v1606_v54, %v1387_v26  ;;  %1633 = vmatprep.mubr.msk.f32.mxu1 %vm95_vm0, %v271_v53 }
  0xf7   :  { %v280_v56 = vpop.f32.mrf.mxu0  ;;  %1634 = vmatmul.mubr.msk.f32.gmra.mxu1 %vm95_vm0, %v276_v51 }
  0xf8   :  { %v281_v57 = vadd.f32 %v1387_v26, %v280_v56  ;;  %1639 = vmatprep.subr.msk.mxu0 %vm95_vm0, %v286_v55  ;;  %1695 = vmatprep.subr.mxu1 %v286_v55 }
  0xf9   :  { %1640 = vmatpush3.xpose.msk.msra.mxu0 %vm95_vm0, %v286_v55  ;;  %1696 = vmatpush3.msra.mxu1 %v286_v55 }
  0xfa   :  { %1636 = vmatprep.mubr.msk.f32.mxu1 %vm95_vm0, %v281_v57  ;;  %1697 = vmatprep.subr.mxu1 %v281_v57 }
  0xfb   :  { %1637 = vmatmul.mubr.msk.f32.gmra.mxu1 %vm95_vm0, %v286_v55  ;;  %1641 = vmatprep.subr.msk.mxu0 %vm95_vm0, %v281_v57  ;;  %v72_v55 = vld [vmem:[%s2693_s1 + $0x58] sm:$0xff] }
  0xfc   :  { %1698 = vmatpush3.msra.mxu1 %v281_v57  ;;  %vm686_vm12 = vcmp.gt.f32.partialorder %v72_v55, 0.0 }
  0xfd   :  { %1699 = vmatprep.subr.mxu1 %v276_v51  ;;  %1642 = vmatpush3.xpose.msk.msra.mxu0 %vm95_vm0, %v281_v57 }
  0xfe   :  { %1700 = vmatpush3.msra.mxu1 %v276_v51  ;;  %1643 = vmatprep.subr.msk.mxu0 %vm95_vm0, %v276_v51 }
  0xff   :  { %1701 = vmatprep.subr.mxu1 %v271_v53 }
 0x100   :  { %1702 = vmatpush3.msra.mxu1 %v271_v53 }
 0x101   :  { %1703 = vmatprep.subr.mxu1 %v266_v47  ;;  %1644 = vmatpush3.xpose.msk.msra.mxu0 %vm95_vm0, %v276_v51 }
 0x102   :  { %1704 = vmatpush3.msra.mxu1 %v266_v47  ;;  %1645 = vmatprep.subr.msk.mxu0 %vm95_vm0, %v271_v53 }
 0x103   :  { %1705 = vmatprep.subr.mxu1 %v261_v49 }
 0x104   :  { %1706 = vmatpush3.msra.mxu1 %v261_v49 }
 0x105   :  { %1707 = vmatprep.subr.mxu1 %v256_v43  ;;  %1646 = vmatpush3.xpose.msk.msra.mxu0 %vm95_vm0, %v271_v53 }
 0x106   :  { %1708 = vmatpush3.msra.mxu1 %v256_v43  ;;  %1647 = vmatprep.subr.msk.mxu0 %vm95_vm0, %v266_v47 }
 0x107   :  { %1709 = vmatprep.subr.mxu1 %v2134_v45 }
 0x108   :  { %1710 = vmatpush3.msra.mxu1 %v2134_v45 }
 0x109   :  { %1711 = vmatprep.subr.mxu1 %v2124_v39  ;;  %1648 = vmatpush3.xpose.msk.msra.mxu0 %vm95_vm0, %v266_v47 }
 0x10a   :  { %1712 = vmatpush3.msra.mxu1 %v2124_v39  ;;  %1649 = vmatprep.subr.msk.mxu0 %vm95_vm0, %v261_v49 }
 0x10b   :  { %1713 = vmatprep.subr.mxu1 %v2128_v41 }
 0x10c   :  { %1714 = vmatpush3.msra.mxu1 %v2128_v41 }
 0x10d   :  { %1715 = vmatprep.subr.mxu1 %v2116_v35  ;;  %1650 = vmatpush3.xpose.msk.msra.mxu0 %vm95_vm0, %v261_v49  ;;  %v70_v49 = vld [vmem:[%s2693_s1 + $0x48] sm:$0xff] }
 0x10e   :  { %1716 = vmatpush3.msra.mxu1 %v2116_v35  ;;  %1651 = vmatprep.subr.msk.mxu0 %vm95_vm0, %v256_v43  ;;  %vm684_vm10 = vcmp.gt.f32.partialorder %v70_v49, 0.0 }
 0x10f   :  { %1717 = vmatprep.subr.mxu1 %v2120_v37 }
 0x110   :  { %1718 = vmatpush3.msra.mxu1 %v2120_v37 }
 0x111   :  { %1719 = vmatprep.subr.mxu1 %v2112_v33  ;;  %1652 = vmatpush3.xpose.msk.msra.mxu0 %vm95_vm0, %v256_v43  ;;  %v68_v43 = vld [vmem:[%s2693_s1 + $0x38] sm:$0xff] }
 0x112   :  { %1720 = vmatpush3.msra.mxu1 %v2112_v33  ;;  %1653 = vmatprep.subr.msk.mxu0 %vm95_vm0, %v2134_v45  ;;  %vm682_vm8 = vcmp.gt.f32.partialorder %v68_v43, 0.0 }
 0x113   :  { %1721 = vmatprep.subr.mxu1 %v2110_v32 }
 0x114   :  { %1722 = vmatpush3.msra.mxu1 %v2110_v32 }
 0x115   :  { %1723 = vmatprep.subr.mxu1 %v2104_v29  ;;  %1654 = vmatpush3.xpose.msk.msra.mxu0 %vm95_vm0, %v2134_v45  ;;  %v69_v45 = vld [vmem:[%s2693_s1 + $0x40] sm:$0xff] }
 0x116   :  { %1724 = vmatpush3.msra.mxu1 %v2104_v29  ;;  %1655 = vmatprep.subr.msk.mxu0 %vm95_vm0, %v2124_v39  ;;  %vm683_vm9 = vcmp.gt.f32.partialorder %v69_v45, 0.0 }
 0x117   :  { %1725 = vmatprep.subr.mxu1 %v2102_v28 }
 0x118   :  { %1726 = vmatpush3.msra.mxu1 %v2102_v28 }
 0x119   :  { %1656 = vmatpush3.xpose.msk.msra.mxu0 %vm95_vm0, %v2124_v39  ;;  %v67_v39 = vld [vmem:[%s2693_s1 + $0x30] sm:$0xff] }
 0x11a   :  { %1657 = vmatprep.subr.msk.mxu0 %vm95_vm0, %v2128_v41  ;;  %vm681_vm7 = vcmp.gt.f32.partialorder %v67_v39, 0.0 }
 0x11d   :  { %1658 = vmatpush3.xpose.msk.msra.mxu0 %vm95_vm0, %v2128_v41 }
 0x11e   :  { %1659 = vmatprep.subr.msk.mxu0 %vm95_vm0, %v2116_v35 }
 0x121   :  { %1660 = vmatpush3.xpose.msk.msra.mxu0 %vm95_vm0, %v2116_v35 }
 0x122   :  { %1661 = vmatprep.subr.msk.mxu0 %vm95_vm0, %v2120_v37 }
 0x125   :  { %1662 = vmatpush3.xpose.msk.msra.mxu0 %vm95_vm0, %v2120_v37 }
 0x126   :  { %1663 = vmatprep.subr.msk.mxu0 %vm95_vm0, %v2112_v33 }
 0x129   :  { %1664 = vmatpush3.xpose.msk.msra.mxu0 %vm95_vm0, %v2112_v33  ;;  %v65_v33 = vld [vmem:[%s2693_s1 + $0x20] sm:$0xff] }
 0x12a   :  { %1665 = vmatprep.subr.msk.mxu0 %vm95_vm0, %v2110_v32  ;;  %vm679_vm5 = vcmp.gt.f32.partialorder %v65_v33, 0.0 }
 0x12d   :  { %1666 = vmatpush3.xpose.msk.msra.mxu0 %vm95_vm0, %v2110_v32  ;;  %v64_v32 = vld [vmem:[%s2693_s1 + $0x18] sm:$0xff] }
 0x12e   :  { %1667 = vmatprep.subr.msk.mxu0 %vm95_vm0, %v2104_v29  ;;  %vm678_vm4 = vcmp.gt.f32.partialorder %v64_v32, 0.0 }
 0x131   :  { %1668 = vmatpush3.xpose.msk.msra.mxu0 %vm95_vm0, %v2104_v29 }
 0x132   :  { %1669 = vmatprep.subr.msk.mxu0 %vm95_vm0, %v2102_v28 }
 0x135   :  { %1670 = vmatpush3.xpose.msk.msra.mxu0 %vm95_vm0, %v2102_v28  ;;  %v63_v28 = vld [vmem:[%s2693_s1 + $0x10] sm:$0xff] }
 0x136   :  { %vm677_vm3 = vcmp.gt.f32.partialorder %v63_v28, 0.0 }
 0x19f   :  { %v1617_v58 = vpop.f32.mrf.mxu1 }
 0x1a1   :  { %v403_v59 = vpop.f32.mrf.mxu1 }
 0x1a2   :  { %1671 = vmatprep.mubr.msk.f32.mxu0 %vm95_vm0, %v403_v59 }
 0x1a3   :  { %v1620_v60 = vpop.f32.mrf.mxu1  ;;  %1672 = vmatmul.mubr.msk.f32.vlgmr.msra.gmra.mxu0 %vm95_vm0, %v1617_v58  ;;  %v73_v58 = vld [vmem:[%s2693_s1 + $0x60] sm:$0xff] }
 0x1a4   :  { %vm687_vm13 = vcmp.gt.f32.partialorder %v73_v58, 0.0 }
 0x1a5   :  { %v413_v61 = vpop.f32.mrf.mxu1 }
 0x1a6   :  { %1674 = vmatprep.mubr.msk.f32.mxu0 %vm95_vm0, %v413_v61  ;;  %v74_v61 = vld [vmem:[%s2693_s1 + $0x68] sm:$0xff] }
 0x1a7   :  { %v1623_v62 = vpop.f32.mrf.mxu1  ;;  %1675 = vmatmul.mubr.msk.f32.gmra.mxu0 %vm95_vm0, %v1620_v60  ;;  %vm688_vm14 = vcmp.gt.f32.partialorder %v74_v61, 0.0 }
 0x1a9   :  { %v423_v63 = vpop.f32.mrf.mxu1 }
 0x1aa   :  { %1677 = vmatprep.mubr.msk.f32.mxu0 %vm95_vm0, %v423_v63 }
 0x1ab   :  { %v1626_v0 = vpop.f32.mrf.mxu1  ;;  %1678 = vmatmul.mubr.msk.f32.gmra.mxu0 %vm95_vm0, %v1623_v62 }
 0x1ad   :  { %v433_v1 = vpop.f32.mrf.mxu1 }
 0x1ae   :  { %1680 = vmatprep.mubr.msk.f32.mxu0 %vm95_vm0, %v433_v1 }
 0x1af   :  { %v1629_v2 = vpop.f32.mrf.mxu1  ;;  %1681 = vmatmul.mubr.msk.f32.gmra.mxu0 %vm95_vm0, %v1626_v0  ;;  %v75_v0 = vld [vmem:[%s2693_s1 + $0x70] sm:$0xff] }
 0x1b0   :  { %vm689_vm15 = vcmp.gt.f32.partialorder %v75_v0, 0.0 }
 0x1b1   :  { %v443_v4 = vpop.f32.mrf.mxu1 }
 0x1b2   :  { %1683 = vmatprep.mubr.msk.f32.mxu0 %vm95_vm0, %v443_v4  ;;  %v76_v4 = vld [vmem:[%s2693_s1 + $0x78] sm:$0xff] }
 0x1b3   :  { %v1632_v5 = vpop.f32.mrf.mxu1  ;;  %1684 = vmatmul.mubr.msk.f32.gmra.mxu0 %vm95_vm0, %v1629_v2 }
 0x1b5   :  { %v453_v8 = vpop.f32.mrf.mxu1 }
 0x1b6   :  { %1686 = vmatprep.mubr.msk.f32.mxu0 %vm95_vm0, %v453_v8 }
 0x1b7   :  { %v1635_v20 = vpop.f32.mrf.mxu1  ;;  %1687 = vmatmul.mubr.msk.f32.gmra.mxu0 %vm95_vm0, %v1632_v5 }
 0x1b9   :  { %v463_v22 = vpop.f32.mrf.mxu1 }
 0x1ba   :  { %1689 = vmatprep.mubr.msk.f32.mxu0 %vm95_vm0, %v463_v22 }
 0x1bb   :  { %v1638_v23 = vpop.f32.mrf.mxu1  ;;  %1690 = vmatmul.mubr.msk.f32.gmra.mxu0 %vm95_vm0, %v1635_v20 }
 0x1bd   :  { %v473_v24 = vpop.f32.mrf.mxu1 }
 0x1be   :  { %1692 = vmatprep.mubr.msk.f32.mxu0 %vm95_vm0, %v473_v24 }
 0x1bf   :  { %1693 = vmatmul.mubr.msk.f32.gmra.mxu0 %vm95_vm0, %v1638_v23 }
 0x263   :  { %v1673_v26 = vpop.f32.mrf.mxu0 }
 0x264   :  { %v2247_v35 = vsel %vm676_vm2, %v1673_v26, -9e+15 }
 0x265   :  { %v596_v29 = vpop.f32.mrf.mxu0 }
 0x266   :  { %v2238_v30 = vsel %vm675_vm1, %v596_v29, -9e+15  ;;  %vm690_vm1 = vcmp.gt.f32.partialorder %v76_v4, 0.0 }
 0x267   :  { %707 = vmax.xlane.f32.xlu0 %v2238_v30  ;;  %v1676_v31 = vpop.f32.mrf.mxu0 }
 0x268   :  { %v2259_v41 = vsel %vm678_vm4, %v1676_v31, -9e+15 }
 0x269   :  { %v606_v34 = vpop.f32.mrf.mxu0 }
 0x26a   :  { %v2249_v36 = vsel %vm677_vm3, %v606_v34, -9e+15 }
 0x26b   :  { %709 = vmax.xlane.f32.xlu0 %v2247_v35  ;;  %711 = vmax.xlane.f32.xlu1 %v2249_v36  ;;  %v1679_v37 = vpop.f32.mrf.mxu0 }
 0x26c   :  { %v2271_v47 = vsel %vm680_vm6, %v1679_v37, -9e+15 }
 0x26d   :  { %v616_v40 = vpop.f32.mrf.mxu0 }
 0x26e   :  { %v2261_v42 = vsel %vm679_vm5, %v616_v40, -9e+15 }
 0x26f   :  { %713 = vmax.xlane.f32.xlu1 %v2259_v41  ;;  %715 = vmax.xlane.f32.xlu0 %v2261_v42  ;;  %v1682_v44 = vpop.f32.mrf.mxu0 }
 0x270   :  { %v2280_v51 = vsel %vm682_vm8, %v1682_v44, -9e+15 }
 0x271   :  { %v626_v46 = vpop.f32.mrf.mxu0 }
 0x272   :  { %v2273_v48 = vsel %vm681_vm7, %v626_v46, -9e+15 }
 0x273   :  { %717 = vmax.xlane.f32.xlu1 %v2271_v47  ;;  %719 = vmax.xlane.f32.xlu0 %v2273_v48  ;;  %v1685_v50 = vpop.f32.mrf.mxu0 }
 0x274   :  { %v2292_v57 = vsel %vm684_vm10, %v1685_v50, -9e+15 }
 0x275   :  { %v636_v53 = vpop.f32.mrf.mxu0 }
 0x276   :  { %v2285_v54 = vsel %vm683_vm9, %v636_v53, -9e+15 }
 0x277   :  { %721 = vmax.xlane.f32.xlu1 %v2280_v51  ;;  %723 = vmax.xlane.f32.xlu0 %v2285_v54  ;;  %v1688_v56 = vpop.f32.mrf.mxu0 }
 0x278   :  { %v2304_v63 = vsel %vm686_vm12, %v1688_v56, -9e+15 }
 0x279   :  { %v646_v59 = vpop.f32.mrf.mxu0 }
 0x27a   :  { %v2297_v60 = vsel %vm685_vm11, %v646_v59, -9e+15 }
 0x27b   :  { %725 = vmax.xlane.f32.xlu1 %v2292_v57  ;;  %727 = vmax.xlane.f32.xlu0 %v2297_v60  ;;  %v1691_v62 = vpop.f32.mrf.mxu0 }
 0x27c   :  { %v2316_v8 = vsel %vm688_vm14, %v1691_v62, -9e+15 }
 0x27d   :  { %v656_v1 = vpop.f32.mrf.mxu0 }
 0x27e   :  { %v2309_v2 = vsel %vm687_vm13, %v656_v1, -9e+15 }
 0x27f   :  { %729 = vmax.xlane.f32.xlu1 %v2304_v63  ;;  %731 = vmax.xlane.f32.xlu0 %v2309_v2  ;;  %v1694_v5 = vpop.f32.mrf.mxu0 }
 0x280   :  { %v2322_v23 = vsel %vm690_vm1, %v1694_v5, -9e+15 }
 0x281   :  { %v666_v20 = vpop.f32.mrf.mxu0 }
 0x282   :  { %v2318_v22 = vsel %vm689_vm15, %v666_v20, -9e+15 }
 0x283   :  { %733 = vmax.xlane.f32.xlu1 %v2316_v8  ;;  %735 = vmax.xlane.f32.xlu0 %v2318_v22 }
 0x287   :  { %737 = vmax.xlane.f32.xlu1 %v2322_v23 }
 0x2f0   :  { %v708_v24 = vpop.xlane.xlu0 %707 }
 0x2f1   :  { %v739_v25 = vsub.f32 %v2238_v30, %v708_v24 }
 0x2f3   :  { %v755_v26 = vmul.f32 1.442695, %v739_v25 }
 0x2f4   :  { %v710_v27 = vpop.xlane.xlu0 %709  ;;  %v712_v28 = vpop.xlane.xlu1 %711 }
 0x2f5   :  { %1757 = vpow2.f32 %v755_v26  ;;  %v740_v29 = vsub.f32 %v2247_v35, %v710_v27  ;;  %v741_v31 = vsub.f32 %v2249_v36, %v712_v28 }
 0x2f7   :  { %v757_v32 = vmul.f32 1.442695, %v740_v29  ;;  %v759_v33 = vmul.f32 1.442695, %v741_v31 }
 0x2f8   :  { %v714_v34 = vpop.xlane.xlu1 %713  ;;  %v716_v37 = vpop.xlane.xlu0 %715 }
 0x2f9   :  { %1759 = vpow2.f32 %v757_v32  ;;  %v742_v38 = vsub.f32 %v2259_v41, %v714_v34  ;;  %v743_v39 = vsub.f32 %v2261_v42, %v716_v37 }
 0x2fa   :  { %1761 = vpow2.f32 %v759_v33 }
 0x2fb   :  { %v761_v40 = vmul.f32 1.442695, %v742_v38  ;;  %v763_v30 = vmul.f32 1.442695, %v743_v39 }
 0x2fc   :  { %v718_v43 = vpop.xlane.xlu1 %717  ;;  %v720_v44 = vpop.xlane.xlu0 %719 }
 0x2fd   :  { %1763 = vpow2.f32 %v761_v40  ;;  %v744_v45 = vsub.f32 %v2271_v47, %v718_v43  ;;  %v745_v35 = vsub.f32 %v2273_v48, %v720_v44 }
 0x2fe   :  { %1765 = vpow2.f32 %v763_v30 }
 0x2ff   :  { %v765_v36 = vmul.f32 1.442695, %v744_v45  ;;  %v767_v46 = vmul.f32 1.442695, %v745_v35 }
 0x300   :  { %v722_v49 = vpop.xlane.xlu1 %721  ;;  %v724_v50 = vpop.xlane.xlu0 %723 }
 0x301   :  { %1767 = vpow2.f32 %v765_v36  ;;  %v746_v41 = vsub.f32 %v2280_v51, %v722_v49  ;;  %v747_v42 = vsub.f32 %v2285_v54, %v724_v50 }
 0x302   :  { %v2334_v52 = vpop.eup %1757  ;;  %1769 = vpow2.f32 %v767_v46 }
 0x303   :  { %v769_v53 = vmul.f32 1.442695, %v746_v41  ;;  %v771_v55 = vmul.f32 1.442695, %v747_v42  ;;  %787 = vadd.xlane.f32.xlu0 %v2334_v52 }
 0x304   :  { %v726_v47 = vpop.xlane.xlu1 %725  ;;  %v728_v56 = vpop.xlane.xlu0 %727 }
 0x305   :  { %1771 = vpow2.f32 %v769_v53  ;;  %v748_v48 = vsub.f32 %v2292_v57, %v726_v47  ;;  %v749_v58 = vsub.f32 %v2297_v60, %v728_v56 }
 0x306   :  { %v2339_v59 = vpop.eup %1759  ;;  %1773 = vpow2.f32 %v771_v55 }
 0x307   :  { %v2341_v51 = vpop.eup %1761  ;;  %v773_v54 = vmul.f32 1.442695, %v748_v48  ;;  %v775_v61 = vmul.f32 1.442695, %v749_v58  ;;  %789 = vadd.xlane.f32.xlu1 %v2339_v59 }
 0x308   :  { %791 = vadd.xlane.f32.xlu0 %v2341_v51  ;;  %v730_v62 = vpop.xlane.xlu1 %729  ;;  %v732_v0 = vpop.xlane.xlu0 %731 }
 0x309   :  { %1775 = vpow2.f32 %v773_v54  ;;  %v750_v1 = vsub.f32 %v2304_v63, %v730_v62  ;;  %v751_v57 = vsub.f32 %v2309_v2, %v732_v0 }
 0x30a   :  { %v2347_v4 = vpop.eup %1763  ;;  %1777 = vpow2.f32 %v775_v61 }
 0x30b   :  { %v2349_v60 = vpop.eup %1765  ;;  %v777_v5 = vmul.f32 1.442695, %v750_v1  ;;  %v779_v20 = vmul.f32 1.442695, %v751_v57  ;;  %793 = vadd.xlane.f32.xlu1 %v2347_v4 }
 0x30c   :  { %795 = vadd.xlane.f32.xlu0 %v2349_v60  ;;  %v734_v24 = vpop.xlane.xlu1 %733  ;;  %v736_v25 = vpop.xlane.xlu0 %735 }
 0x30d   :  { %1779 = vpow2.f32 %v777_v5  ;;  %v752_v26 = vsub.f32 %v2316_v8, %v734_v24  ;;  %v753_v63 = vsub.f32 %v2318_v22, %v736_v25 }
 0x30e   :  { %v2355_v27 = vpop.eup %1767  ;;  %1781 = vpow2.f32 %v779_v20 }
 0x30f   :  { %v2357_v2 = vpop.eup %1769  ;;  %v781_v28 = vmul.f32 1.442695, %v752_v26  ;;  %v783_v29 = vmul.f32 1.442695, %v753_v63  ;;  %797 = vadd.xlane.f32.xlu1 %v2355_v27 }
 0x310   :  { %799 = vadd.xlane.f32.xlu0 %v2357_v2  ;;  %v738_v31 = vpop.xlane.xlu1 %737 }
 0x311   :  { %1783 = vpow2.f32 %v781_v28  ;;  %v754_v32 = vsub.f32 %v2322_v23, %v738_v31 }
 0x312   :  { %v2362_v33 = vpop.eup %1771  ;;  %1785 = vpow2.f32 %v783_v29 }
 0x313   :  { %v2364_v8 = vpop.eup %1773  ;;  %v785_v22 = vmul.f32 1.442695, %v754_v32  ;;  %801 = vadd.xlane.f32.xlu1 %v2362_v33 }
 0x314   :  { %803 = vadd.xlane.f32.xlu0 %v2364_v8 }
 0x315   :  { %1787 = vpow2.f32 %v785_v22 }
 0x316   :  { %v2368_v34 = vpop.eup %1775 }
 0x317   :  { %v2370_v37 = vpop.eup %1777  ;;  %805 = vadd.xlane.f32.xlu1 %v2368_v34 }
 0x318   :  { %807 = vadd.xlane.f32.xlu0 %v2370_v37 }
 0x31a   :  { %v2374_v23 = vpop.eup %1779 }
 0x31b   :  { %v2376_v38 = vpop.eup %1781  ;;  %809 = vadd.xlane.f32.xlu1 %v2374_v23 }
 0x31c   :  { %811 = vadd.xlane.f32.xlu0 %v2376_v38 }
 0x31e   :  { %v2380_v39 = vpop.eup %1783 }
 0x31f   :  { %v2382_v40 = vpop.eup %1785  ;;  %813 = vadd.xlane.f32.xlu1 %v2380_v39 }
 0x320   :  { %815 = vadd.xlane.f32.xlu0 %v2382_v40 }
 0x322   :  { %v2386_v30 = vpop.eup %1787 }
 0x323   :  { %817 = vadd.xlane.f32.xlu1 %v2386_v30 }
 0x38c   :  { %v788_v43 = vpop.xlane.xlu0 %787 }
 0x38d   :  { %1789 = vrcp.f32 %v788_v43 }
 0x390   :  { %v790_v44 = vpop.xlane.xlu1 %789 }
 0x391   :  { %1791 = vrcp.f32 %v790_v44  ;;  %v792_v45 = vpop.xlane.xlu0 %791 }
 0x392   :  { %1793 = vrcp.f32 %v792_v45 }
 0x394   :  { %v794_v35 = vpop.xlane.xlu1 %793 }
 0x395   :  { %1795 = vrcp.f32 %v794_v35  ;;  %v796_v36 = vpop.xlane.xlu0 %795 }
 0x396   :  { %1797 = vrcp.f32 %v796_v36  ;;  %v2413_v36 = vld [vmem:[%s2698_s6] ss:$0 sm:$0xff] }
 0x398   :  { %v798_v46 = vpop.xlane.xlu1 %797 }
 0x399   :  { %1799 = vrcp.f32 %v798_v46  ;;  %v800_v49 = vpop.xlane.xlu0 %799 }
 0x39a   :  { %v1790_v50 = vpop.eup %1789  ;;  %1801 = vrcp.f32 %v800_v49 }
 0x39b   :  { %v820_v41 = vmul.f32 %v1790_v50, %v2334_v52 }
 0x39c   :  { %v802_v42 = vpop.xlane.xlu1 %801 }
 0x39d   :  { %1803 = vrcp.f32 %v802_v42  ;;  %v804_v53 = vpop.xlane.xlu0 %803  ;;  %1727 = vmatprep.mubr.f32.mxu1 %v820_v41 }
 0x39e   :  { %v1792_v55 = vpop.eup %1791  ;;  %1805 = vrcp.f32 %v804_v53 }
 0x39f   :  { %v1794_v47 = vpop.eup %1793  ;;  %v822_v56 = vmul.f32 %v1792_v55, %v2339_v59 }
 0x3a0   :  { %v806_v48 = vpop.xlane.xlu1 %805  ;;  %v824_v58 = vmul.f32 %v1794_v47, %v2341_v51 }
 0x3a1   :  { %1807 = vrcp.f32 %v806_v48  ;;  %v808_v54 = vpop.xlane.xlu0 %807  ;;  %1728 = vmatmul.mubr.f32.vlgmr.msra.gmra.mxu1 %v822_v56 }
 0x3a2   :  { %v1796_v61 = vpop.eup %1795  ;;  %1809 = vrcp.f32 %v808_v54  ;;  %1730 = vmatprep.mubr.f32.mxu1 %v824_v58 }
 0x3a3   :  { %v1798_v62 = vpop.eup %1797  ;;  %v826_v52 = vmul.f32 %v1796_v61, %v2347_v4 }
 0x3a4   :  { %v810_v0 = vpop.xlane.xlu1 %809  ;;  %v828_v1 = vmul.f32 %v1798_v62, %v2349_v60 }
 0x3a5   :  { %1811 = vrcp.f32 %v810_v0  ;;  %v812_v57 = vpop.xlane.xlu0 %811  ;;  %1731 = vmatmul.mubr.f32.gmra.mxu1 %v826_v52 }
 0x3a6   :  { %v1800_v5 = vpop.eup %1799  ;;  %1813 = vrcp.f32 %v812_v57  ;;  %1733 = vmatprep.mubr.f32.mxu1 %v828_v1 }
 0x3a7   :  { %v1802_v59 = vpop.eup %1801  ;;  %v830_v51 = vmul.f32 %v1800_v5, %v2355_v27 }
 0x3a8   :  { %v814_v20 = vpop.xlane.xlu1 %813  ;;  %v832_v24 = vmul.f32 %v1802_v59, %v2357_v2 }
 0x3a9   :  { %1815 = vrcp.f32 %v814_v20  ;;  %v816_v25 = vpop.xlane.xlu0 %815  ;;  %1734 = vmatmul.mubr.f32.gmra.mxu1 %v830_v51 }
 0x3aa   :  { %v1804_v26 = vpop.eup %1803  ;;  %1817 = vrcp.f32 %v816_v25  ;;  %1736 = vmatprep.mubr.f32.mxu1 %v832_v24 }
 0x3ab   :  { %v1806_v4 = vpop.eup %1805  ;;  %v834_v60 = vmul.f32 %v1804_v26, %v2362_v33 }
 0x3ac   :  { %v818_v63 = vpop.xlane.xlu1 %817  ;;  %v836_v28 = vmul.f32 %v1806_v4, %v2364_v8 }
 0x3ad   :  { %1819 = vrcp.f32 %v818_v63  ;;  %1737 = vmatmul.mubr.f32.gmra.mxu1 %v834_v60 }
 0x3ae   :  { %v1808_v29 = vpop.eup %1807  ;;  %1739 = vmatprep.mubr.f32.mxu1 %v836_v28 }
 0x3af   :  { %v1810_v27 = vpop.eup %1809  ;;  %v838_v31 = vmul.f32 %v1808_v29, %v2368_v34 }
 0x3b0   :  { %v840_v2 = vmul.f32 %v1810_v27, %v2370_v37 }
 0x3b1   :  { %1740 = vmatmul.mubr.f32.gmra.mxu1 %v838_v31 }
 0x3b2   :  { %v1812_v32 = vpop.eup %1811  ;;  %1742 = vmatprep.mubr.f32.mxu1 %v840_v2 }
 0x3b3   :  { %v1814_v22 = vpop.eup %1813  ;;  %v842_v43 = vmul.f32 %v1812_v32, %v2374_v23  ;;  %v2408_v23 = vld [vmem:[%s2697_s5] ss:$0 sm:$0xff] }
 0x3b4   :  { %v844_v33 = vmul.f32 %v1814_v22, %v2376_v38  ;;  %v1021_v47 = vmul.f32 %v2408_v23, %v2014_v9  ;;  %v1020_v56 = vmul.f32 %v2408_v23, %v2005_v7  ;;  %v1023_v62 = vmul.f32 %v2408_v23, %v2028_v11 }
 0x3b5   :  { %1743 = vmatmul.mubr.f32.gmra.mxu1 %v842_v43  ;;  %v1022_v57 = vmul.f32 %v2408_v23, %v2019_v10  ;;  %v1025_v24 = vmul.f32 %v2408_v23, %v2042_v13  ;;  %v1024_v63 = vmul.f32 %v2408_v23, %v2033_v12  ;;  %v1027_v2 = vmul.f32 %v2408_v23, %v2056_v15 }
 0x3b6   :  { %v1816_v44 = vpop.eup %1815  ;;  %1745 = vmatprep.mubr.f32.mxu1 %v844_v33 }
 0x3b7   :  { %v1818_v8 = vpop.eup %1817  ;;  %v846_v45 = vmul.f32 %v1816_v44, %v2380_v39  ;;  %v1026_v44 = vmul.f32 %v2408_v23, %v2047_v14 }
 0x3b8   :  { %v848_v35 = vmul.f32 %v1818_v8, %v2382_v40  ;;  %v1019_v40 = vmul.f32 %v2408_v23, %v2000_v6 }
 0x3b9   :  { %1746 = vmatmul.mubr.f32.gmra.mxu1 %v846_v45 }
 0x3ba   :  { %v1820_v34 = vpop.eup %1819  ;;  %1748 = vmatprep.mubr.f32.mxu1 %v848_v35 }
 0x3bb   :  { %v850_v37 = vmul.f32 %v1820_v34, %v2386_v30  ;;  %v1018_v30 = vmul.f32 %v2408_v23, %v1987_v3 }
 0x3bd   :  { %1749 = vmatmul.mubr.f32.gmra.mxu1 %v850_v37  ;;  %v1029_v37 = vmul.f32 %v2408_v23, %v2070_v17 }
 0x461   :  { %v1729_v38 = vpop.f32.mrf.mxu1 }
 0x462   :  { %v2415_v39 = vmax.f32 %v1729_v38, 0.0 }
 0x463   :  { %v917_v46 = vpop.f32.mrf.mxu1 }
 0x464   :  { %v2421_v49 = vmax.f32 %v917_v46, 0.0  ;;  %v1041_v50 = vmul.f32 %v2413_v36, %v2415_v39 }
 0x465   :  { %v1732_v41 = vpop.f32.mrf.mxu1 }
 0x466   :  { %v2425_v42 = vmax.f32 %v1732_v41, 0.0  ;;  %v1057_v53 = vadd.f32 %v1041_v50, %v1019_v40  ;;  %v1040_v55 = vmul.f32 %v2413_v36, %v2421_v49  ;;  %v1028_v50 = vmul.f32 %v2408_v23, %v2061_v16 }
 0x467   :  { %v927_v6 = vpop.f32.mrf.mxu1 }
 0x468   :  { %v2433_v3 = vmax.f32 %v927_v6, 0.0  ;;  %v1075_v48 = vsel %vm95_vm0, %v1057_v53, 0.0  ;;  %v1056_v58 = vadd.f32 %v1040_v55, %v1018_v30  ;;  %v1043_v54 = vmul.f32 %v2413_v36, %v2425_v42 }
 0x469   :  { %1076 = vadd.xlane.f32.xlu1 %v1075_v48  ;;  %v1735_v61 = vpop.f32.mrf.mxu1  ;;  %v1031_v6 = vmul.f32 %v2408_v23, %v2084_v19 }
 0x46a   :  { %v2440_v52 = vmax.f32 %v1735_v61, 0.0  ;;  %v1072_v9 = vsel %vm95_vm0, %v1056_v58, 0.0  ;;  %v1059_v0 = vadd.f32 %v1043_v54, %v1021_v47  ;;  %v1042_v7 = vmul.f32 %v2413_v36, %v2433_v3 }
 0x46b   :  { %1073 = vadd.xlane.f32.xlu0 %v1072_v9  ;;  %v937_v1 = vpop.f32.mrf.mxu1  ;;  %v1030_v61 = vmul.f32 %v2408_v23, %v2075_v18 }
 0x46c   :  { %v2447_v5 = vmax.f32 %v937_v1, 0.0  ;;  %v1081_v59 = vsel %vm95_vm0, %v1059_v0, 0.0  ;;  %v1058_v51 = vadd.f32 %v1042_v7, %v1020_v56  ;;  %v1045_v11 = vmul.f32 %v2413_v36, %v2440_v52 }
 0x46d   :  { %1082 = vadd.xlane.f32.xlu1 %v1081_v59  ;;  %v1738_v20 = vpop.f32.mrf.mxu1  ;;  %v1033_v1 = vmul.f32 %v2408_v23, %v2095_v21 }
 0x46e   :  { %v2454_v25 = vmax.f32 %v1738_v20, 0.0  ;;  %v1078_v26 = vsel %vm95_vm0, %v1058_v51, 0.0  ;;  %v1061_v4 = vadd.f32 %v1045_v11, %v1023_v62  ;;  %v1044_v10 = vmul.f32 %v2413_v36, %v2447_v5  ;;  %v2518_v20 = vld [vmem:[%s2692_s0 + $0x70] sm:$0xff] }
 0x46f   :  { %1079 = vadd.xlane.f32.xlu0 %v1078_v26  ;;  %v947_v60 = vpop.f32.mrf.mxu1 }
 0x470   :  { %v2461_v28 = vmax.f32 %v947_v60, 0.0  ;;  %v1087_v29 = vsel %vm95_vm0, %v1061_v4, 0.0  ;;  %v1060_v27 = vadd.f32 %v1044_v10, %v1022_v57  ;;  %v1047_v13 = vmul.f32 %v2413_v36, %v2454_v25 }
 0x471   :  { %1088 = vadd.xlane.f32.xlu1 %v1087_v29  ;;  %v1741_v31 = vpop.f32.mrf.mxu1 }
 0x472   :  { %v2468_v32 = vmax.f32 %v1741_v31, 0.0  ;;  %v1084_v22 = vsel %vm95_vm0, %v1060_v27, 0.0  ;;  %v1063_v43 = vadd.f32 %v1047_v13, %v1025_v24  ;;  %v1046_v12 = vmul.f32 %v2413_v36, %v2461_v28 }
 0x473   :  { %1085 = vadd.xlane.f32.xlu0 %v1084_v22  ;;  %v957_v33 = vpop.f32.mrf.mxu1  ;;  %v1032_v24 = vmul.f32 %v2518_v20, %v2408_v23  ;;  %v1926_v31 = vmov 0  }
 0x474   :  { %v2475_v8 = vmax.f32 %v957_v33, 0.0  ;;  %v1093_v45 = vsel %vm95_vm0, %v1063_v43, 0.0  ;;  %v1062_v35 = vadd.f32 %v1046_v12, %v1024_v63  ;;  %v1049_v15 = vmul.f32 %v2413_v36, %v2468_v32  ;;  %1755 = vset.pattern.permute.xlu1 %v1926_v31  ;;  %1756 = vset.pattern.permute.xlu0 %v1926_v31 }
 0x475   :  { %1094 = vadd.xlane.f32.xlu1 %v1093_v45  ;;  %v1744_v34 = vpop.f32.mrf.mxu1 }
 0x476   :  { %v2482_v38 = vmax.f32 %v1744_v34, 0.0  ;;  %v1090_v40 = vsel %vm95_vm0, %v1062_v35, 0.0  ;;  %v1065_v46 = vadd.f32 %v1049_v15, %v1027_v2  ;;  %v1048_v14 = vmul.f32 %v2413_v36, %v2475_v8  ;;  %v2532_v2 = vld [vmem:[#allocation2] ss:$0 sm:$0xff] }
 0x477   :  { %1091 = vadd.xlane.f32.xlu0 %v1090_v40  ;;  %v967_v30 = vpop.f32.mrf.mxu1 }
 0x478   :  { %v2489_v41 = vmax.f32 %v967_v30, 0.0  ;;  %v1099_v53 = vsel %vm95_vm0, %v1065_v46, 0.0  ;;  %v1064_v55 = vadd.f32 %v1048_v14, %v1026_v44  ;;  %v1051_v17 = vmul.f32 %v2413_v36, %v2482_v38 }
 0x479   :  { %1100 = vadd.xlane.f32.xlu1 %v1099_v53  ;;  %v1747_v47 = vpop.f32.mrf.mxu1 }
 0x47a   :  { %v2496_v56 = vmax.f32 %v1747_v47, 0.0  ;;  %v1096_v48 = vsel %vm95_vm0, %v1064_v55, 0.0  ;;  %v1067_v58 = vadd.f32 %v1051_v17, %v1029_v37  ;;  %v1050_v16 = vmul.f32 %v2413_v36, %v2489_v41 }
 0x47b   :  { %1097 = vadd.xlane.f32.xlu0 %v1096_v48  ;;  %v977_v54 = vpop.f32.mrf.mxu1 }
 0x47c   :  { %v2503_v62 = vmax.f32 %v977_v54, 0.0  ;;  %v1105_v9 = vsel %vm95_vm0, %v1067_v58, 0.0  ;;  %v1066_v0 = vadd.f32 %v1050_v16, %v1028_v50  ;;  %v1053_v19 = vmul.f32 %v2413_v36, %v2496_v56 }
 0x47d   :  { %1106 = vadd.xlane.f32.xlu1 %v1105_v9  ;;  %v1750_v7 = vpop.f32.mrf.mxu1 }
 0x47e   :  { %v2510_v57 = vmax.f32 %v1750_v7, 0.0  ;;  %v1102_v59 = vsel %vm95_vm0, %v1066_v0, 0.0  ;;  %v1069_v51 = vadd.f32 %v1053_v19, %v1031_v6  ;;  %v1052_v18 = vmul.f32 %v2413_v36, %v2503_v62 }
 0x47f   :  { %1103 = vadd.xlane.f32.xlu0 %v1102_v59  ;;  %v987_v11 = vpop.f32.mrf.mxu1 }
 0x480   :  { %v2522_v26 = vmax.f32 %v987_v11, 0.0  ;;  %v1111_v21 = vsel %vm95_vm0, %v1069_v51, 0.0  ;;  %v1068_v4 = vadd.f32 %v1052_v18, %v1030_v61  ;;  %v1055_v10 = vmul.f32 %v2413_v36, %v2510_v57 }
 0x481   :  { %1112 = vadd.xlane.f32.xlu1 %v1111_v21 }
 0x482   :  { %v1054_v60 = vmul.f32 %v2413_v36, %v2522_v26  ;;  %v1108_v63 = vsel %vm95_vm0, %v1068_v4, 0.0  ;;  %v1071_v29 = vadd.f32 %v1055_v10, %v1033_v1 }
 0x483   :  { %1109 = vadd.xlane.f32.xlu0 %v1108_v63 }
 0x484   :  { %v1117_v27 = vsel %vm95_vm0, %v1071_v29, 0.0  ;;  %v1070_v13 = vadd.f32 %v1054_v60, %v1032_v24 }
 0x485   :  { %1118 = vadd.xlane.f32.xlu1 %v1117_v27 }
 0x486   :  { %v1114_v23 = vsel %vm95_vm0, %v1070_v13, 0.0 }
 0x487   :  { %1115 = vadd.xlane.f32.xlu0 %v1114_v23 }
 0x4f2   :  { %v1077_v22 = vpop.xlane.xlu1 %1076 }
 0x4f3   :  { %v1127_v43 = vadd.f32 %v2532_v2, %v1077_v22 }
 0x4f4   :  { %v1074_v36 = vpop.xlane.xlu0 %1073 }
 0x4f5   :  { %v1456_v12 = vmul.f32 -1.442695, %v1127_v43  ;;  %v1126_v33 = vadd.f32 %v2532_v2, %v1074_v36 }
 0x4f6   :  { %v1083_v44 = vpop.xlane.xlu1 %1082 }
 0x4f7   :  { %1821 = vpow2.f32 %v1456_v12  ;;  %v1455_v45 = vmul.f32 -1.442695, %v1126_v33  ;;  %v1129_v35 = vadd.f32 %v2532_v2, %v1083_v44 }
 0x4f8   :  { %v1080_v15 = vpop.xlane.xlu0 %1079 }
 0x4f9   :  { %1823 = vpow2.f32 %v1455_v45  ;;  %v1458_v34 = vmul.f32 -1.442695, %v1129_v35  ;;  %v1128_v37 = vadd.f32 %v2532_v2, %v1080_v15 }
 0x4fa   :  { %v1089_v40 = vpop.xlane.xlu1 %1088 }
 0x4fb   :  { %1825 = vpow2.f32 %v1458_v34  ;;  %v1457_v46 = vmul.f32 -1.442695, %v1128_v37  ;;  %v1131_v14 = vadd.f32 %v2532_v2, %v1089_v40 }
 0x4fc   :  { %v1086_v30 = vpop.xlane.xlu0 %1085 }
 0x4fd   :  { %1827 = vpow2.f32 %v1457_v46  ;;  %v1460_v50 = vmul.f32 -1.442695, %v1131_v14  ;;  %v1130_v53 = vadd.f32 %v2532_v2, %v1086_v30 }
 0x4fe   :  { %v1095_v55 = vpop.xlane.xlu1 %1094 }
 0x4ff   :  { %1829 = vpow2.f32 %v1460_v50  ;;  %v1459_v17 = vmul.f32 -1.442695, %v1130_v53  ;;  %v1133_v47 = vadd.f32 %v2532_v2, %v1095_v55 }
 0x500   :  { %v1092_v6 = vpop.xlane.xlu0 %1091 }
 0x501   :  { %1831 = vpow2.f32 %v1459_v17  ;;  %v1462_v48 = vmul.f32 -1.442695, %v1133_v47  ;;  %v1132_v58 = vadd.f32 %v2532_v2, %v1092_v6 }
 0x502   :  { %v1101_v16 = vpop.xlane.xlu1 %1100 }
 0x503   :  { %v1135_v54 = vadd.f32 %v2532_v2, %v1101_v16  ;;  %1833 = vpow2.f32 %v1462_v48  ;;  %v1461_v1 = vmul.f32 -1.442695, %v1132_v58 }
 0x504   :  { %v1822_v61 = vpop.eup %1821  ;;  %v1098_v9 = vpop.xlane.xlu0 %1097 }
 0x505   :  { %v1191_v0 = vadd.f32 1.0, %v1822_v61  ;;  %v1464_v19 = vmul.f32 -1.442695, %v1135_v54  ;;  %v1134_v59 = vadd.f32 %v2532_v2, %v1098_v9 }
 0x506   :  { %v1824_v7 = vpop.eup %1823  ;;  %v1107_v51 = vpop.xlane.xlu1 %1106 }
 0x507   :  { %1835 = vrcp.f32 %v1191_v0  ;;  %v1190_v18 = vadd.f32 1.0, %v1824_v7  ;;  %v1137_v11 = vadd.f32 %v2532_v2, %v1107_v51  ;;  %v1463_v63 = vmul.f32 -1.442695, %v1134_v59 }
 0x508   :  { %v1826_v24 = vpop.eup %1825  ;;  %1837 = vpow2.f32 %v1464_v19  ;;  %v1104_v21 = vpop.xlane.xlu0 %1103 }
 0x509   :  { %1839 = vrcp.f32 %v1190_v18  ;;  %v1193_v4 = vadd.f32 1.0, %v1826_v24  ;;  %v1466_v10 = vmul.f32 -1.442695, %v1137_v11  ;;  %v1136_v29 = vadd.f32 %v2532_v2, %v1104_v21 }
 0x50a   :  { %v1828_v60 = vpop.eup %1827  ;;  %1841 = vpow2.f32 %v1461_v1  ;;  %v1113_v27 = vpop.xlane.xlu1 %1112 }
 0x50b   :  { %1843 = vrcp.f32 %v1193_v4  ;;  %v1192_v13 = vadd.f32 1.0, %v1828_v60  ;;  %v1139_v23 = vadd.f32 %v2532_v2, %v1113_v27  ;;  %v1465_v36 = vmul.f32 -1.442695, %v1136_v29 }
 0x50c   :  { %v1830_v31 = vpop.eup %1829  ;;  %1845 = vpow2.f32 %v1466_v10  ;;  %v1110_v22 = vpop.xlane.xlu0 %1109 }
 0x50d   :  { %v1468_v43 = vmul.f32 -1.442695, %v1139_v23  ;;  %1847 = vpow2.f32 %v1463_v63  ;;  %v1195_v44 = vadd.f32 1.0, %v1830_v31  ;;  %v1138_v45 = vadd.f32 %v2532_v2, %v1110_v22 }
 0x50e   :  { %v1119_v12 = vpop.xlane.xlu1 %1118  ;;  %v1832_v33 = vpop.eup %1831  ;;  %1849 = vrcp.f32 %v1192_v13 }
 0x50f   :  { %v1141_v35 = vadd.f32 %v2532_v2, %v1119_v12  ;;  %1851 = vpow2.f32 %v1468_v43  ;;  %v1194_v37 = vadd.f32 1.0, %v1832_v33  ;;  %v1467_v46 = vmul.f32 -1.442695, %v1138_v45  ;;  %v1886_v12 = vld [vmem:[%s2692_s0 + $0x8] sm:$0xff] }
 0x510   :  { %v1116_v15 = vpop.xlane.xlu0 %1115  ;;  %1853 = vpow2.f32 %v1465_v36  ;;  %v1834_v40 = vpop.eup %1833  ;;  %v1239_v33 = vsub.f32 %v1886_v12, %v2415_v39 }
 0x511   :  { %v1470_v34 = vmul.f32 -1.442695, %v1141_v35  ;;  %1855 = vrcp.f32 %v1195_v44  ;;  %v1140_v14 = vadd.f32 %v2532_v2, %v1116_v15  ;;  %v1197_v55 = vadd.f32 1.0, %v1834_v40  ;;  %v1887_v35 = vld [vmem:[%s2692_s0] sm:$0xff] }
 0x512   :  { %v1238_v15 = vsub.f32 %v1887_v35, %v2421_v49 }
 0x513   :  { %1857 = vpow2.f32 %v1470_v34  ;;  %v1469_v6 = vmul.f32 -1.442695, %v1140_v14 }
 0x514   :  { %v1836_v30 = vpop.eup %1835  ;;  %1859 = vrcp.f32 %v1194_v37 }
 0x515   :  { %v1838_v50 = vpop.eup %1837  ;;  %1261 = vperm.xlu1 %1755, %v1836_v30   ;;  %1861 = vpow2.f32 %v1467_v46  ;;  %v1888_v46 = vld [vmem:[%s2692_s0 + $0x18] sm:$0xff] }
 0x516   :  { %v1840_v53 = vpop.eup %1839  ;;  %v1199_v17 = vadd.f32 1.0, %v1838_v50  ;;  %v1241_v14 = vsub.f32 %v1888_v46, %v2425_v42 }
 0x517   :  { %v1842_v47 = vpop.eup %1841  ;;  %1256 = vperm.xlu0 %1756, %v1840_v53  }
 0x518   :  { %v1844_v48 = vpop.eup %1843  ;;  %1863 = vrcp.f32 %v1199_v17  ;;  %v1196_v2 = vadd.f32 1.0, %v1842_v47 }
 0x519   :  { %v1846_v58 = vpop.eup %1845  ;;  %1271 = vperm.xlu1 %1755, %v1844_v48   ;;  %1865 = vrcp.f32 %v1197_v55  ;;  %v1889_v55 = vld [vmem:[%s2692_s0 + $0x10] sm:$0xff]  ;;  %v1890_v48 = vld [vmem:[%s2692_s0 + $0x28] sm:$0xff] }
 0x51a   :  { %v1201_v16 = vadd.f32 1.0, %v1846_v58  ;;  %v1848_v54 = vpop.eup %1847  ;;  %1867 = vpow2.f32 %v1469_v6  ;;  %v1240_v17 = vsub.f32 %v1889_v55, %v2433_v3  ;;  %v1252_v55 = vsub.f32 %v2518_v20, %v2522_v26 }
 0x51b   :  { %v1850_v61 = vpop.eup %1849  ;;  %v1198_v7 = vadd.f32 1.0, %v1848_v54 }
 0x51c   :  { %1869 = vrcp.f32 %v1201_v16  ;;  %v1852_v9 = vpop.eup %1851 }
 0x51d   :  { %1266 = vperm.xlu1 %1755, %v1850_v61   ;;  %v1203_v0 = vadd.f32 1.0, %v1852_v9  ;;  %v1854_v19 = vpop.eup %1853  ;;  %1871 = vrcp.f32 %v1196_v2  ;;  %v1891_v2 = vld [vmem:[%s2692_s0 + $0x20] sm:$0xff]  ;;  %v1892_v9 = vld [vmem:[%s2692_s0 + $0x48] sm:$0xff] }
 0x51e   :  { %v1856_v1 = vpop.eup %1855  ;;  %v1200_v11 = vadd.f32 1.0, %v1854_v19 }
 0x51f   :  { %1873 = vrcp.f32 %v1203_v0  ;;  %v1247_v0 = vsub.f32 %v1892_v9, %v2468_v32 }
 0x520   :  { %v1858_v59 = vpop.eup %1857  ;;  %1875 = vrcp.f32 %v1198_v7 }
 0x521   :  { %1281 = vperm.xlu1 %1755, %v1856_v1   ;;  %v1205_v51 = vadd.f32 1.0, %v1858_v59  ;;  %v1860_v18 = vpop.eup %1859  ;;  %v1893_v59 = vld [vmem:[%s2692_s0 + $0x38] sm:$0xff] }
 0x522   :  { %v1862_v24 = vpop.eup %1861 }
 0x523   :  { %1877 = vrcp.f32 %v1205_v51  ;;  %v1202_v10 = vadd.f32 1.0, %v1862_v24  ;;  %v1245_v51 = vsub.f32 %v1893_v59, %v2454_v25  ;;  %v1894_v24 = vld [vmem:[%s2692_s0 + $0x58] sm:$0xff] }
 0x524   :  { %1879 = vrcp.f32 %v1200_v11 }
 0x525   :  { %v1864_v21 = vpop.eup %1863  ;;  %1276 = vperm.xlu1 %1755, %v1860_v18   ;;  %1881 = vrcp.f32 %v1202_v10 }
 0x526   :  { %1301 = vperm.xlu0 %1756, %v1864_v21   ;;  %v1866_v4 = vpop.eup %1865  ;;  %v1249_v21 = vsub.f32 %v1894_v24, %v2482_v38 }
 0x527   :  { %v1868_v60 = vpop.eup %1867 }
 0x528   :  { %v1204_v29 = vadd.f32 1.0, %v1868_v60  ;;  %v1895_v60 = vld [vmem:[%s2692_s0 + $0x30] sm:$0xff] }
 0x529   :  { %v1870_v63 = vpop.eup %1869  ;;  %1291 = vperm.xlu1 %1755, %v1866_v4  }
 0x52a   :  { %1311 = vperm.xlu0 %1756, %v1870_v63   ;;  %v1872_v27 = vpop.eup %1871  ;;  %1883 = vrcp.f32 %v1204_v29  ;;  %v1244_v63 = vsub.f32 %v1895_v60, %v2461_v28 }
 0x52c   :  { %v1874_v13 = vpop.eup %1873 }
 0x52d   :  { %1286 = vperm.xlu1 %1755, %v1872_v27   ;;  %v1876_v23 = vpop.eup %1875 }
 0x52e   :  { %1321 = vperm.xlu0 %1756, %v1874_v13   ;;  %v1896_v13 = vld [vmem:[%s2692_s0 + $0x68] sm:$0xff] }
 0x530   :  { %v1878_v31 = vpop.eup %1877 }
 0x531   :  { %1296 = vperm.xlu1 %1755, %v1876_v23   ;;  %v1880_v22 = vpop.eup %1879  ;;  %v1251_v23 = vsub.f32 %v1896_v13, %v2496_v56 }
 0x532   :  { %1331 = vperm.xlu0 %1756, %v1878_v31   ;;  %v1882_v43 = vpop.eup %1881 }
 0x535   :  { %1306 = vperm.xlu1 %1755, %v1880_v22  }
 0x537   :  { %v1884_v36 = vpop.eup %1883 }
 0x539   :  { %1316 = vperm.xlu1 %1755, %v1882_v43   ;;  %v1897_v43 = vld [vmem:[%s2692_s0 + $0x40] sm:$0xff] }
 0x53d   :  { %1326 = vperm.xlu1 %1755, %v1884_v36   ;;  %v1246_v36 = vsub.f32 %v1897_v43, %v2475_v8 }
 0x590   :  { %v1262_v44 = vpop.permute.xlu1 %1261 }
 0x591   :  { %v1335_v45 = vmul.f32 %v1262_v44, %v1239_v33  ;;  %v1898_v44 = vld [vmem:[%s2692_s0 + $0x78] sm:$0xff] }
 0x592   :  { %v1257_v34 = vpop.permute.xlu0 %1256 }
 0x593   :  { %v1351_v37 = vadd.f32 %v1335_v45, %v2415_v39  ;;  %v1334_v40 = vmul.f32 %v1257_v34, %v1238_v15  ;;  %v1253_v45 = vsub.f32 %v1898_v44, %v2510_v57  ;;  %v1899_v34 = vld [vmem:[%s2692_s0 + $0x50] sm:$0xff] }
 0x594   :  { %v1272_v30 = vpop.permute.xlu1 %1271 }
 0x595   :  { %1367 = vst.msk [vmem:[%s2700_s8 + $0x8] sm:$0xff] %vm95_vm0, %v1351_v37  ;;  %v1350_v50 = vadd.f32 %v1334_v40, %v2421_v49  ;;  %v1337_v53 = vmul.f32 %v1272_v30, %v1241_v14  ;;  %v1248_v37 = vsub.f32 %v1899_v34, %v2489_v41  ;;  %v1900_v30 = vld [vmem:[%s2692_s0 + $0x60] sm:$0xff] }
 0x597   :  { %1366 = vst.msk [vmem:[%s2700_s8] sm:$0xff] %vm95_vm0, %v1350_v50  ;;  %v1353_v39 = vadd.f32 %v1337_v53, %v2425_v42  ;;  %v1243_v42 = vsub.f32 %v1890_v48, %v2440_v52 }
 0x598   :  { %v1267_v47 = vpop.permute.xlu1 %1266 }
 0x599   :  { %1369 = vst.msk [vmem:[%s2700_s8 + $0x18] sm:$0xff] %vm95_vm0, %v1353_v39  ;;  %v1336_v49 = vmul.f32 %v1267_v47, %v1240_v17 }
 0x59b   :  { %v1352_v6 = vadd.f32 %v1336_v49, %v2433_v3  ;;  %v1242_v3 = vsub.f32 %v1891_v2, %v2447_v5 }
 0x59c   :  { %v1282_v58 = vpop.permute.xlu1 %1281 }
 0x59d   :  { %1368 = vst.msk [vmem:[%s2700_s8 + $0x10] sm:$0xff] %vm95_vm0, %v1352_v6  ;;  %v1339_v16 = vmul.f32 %v1282_v58, %v1243_v42 }
 0x59f   :  { %v1355_v54 = vadd.f32 %v1339_v16, %v2440_v52 }
 0x5a0   :  { %v1277_v61 = vpop.permute.xlu1 %1276 }
 0x5a1   :  { %1371 = vst.msk [vmem:[%s2700_s8 + $0x28] sm:$0xff] %vm95_vm0, %v1355_v54  ;;  %v1338_v19 = vmul.f32 %v1277_v61, %v1242_v3  ;;  %v1302_v52 = vpop.permute.xlu0 %1301 }
 0x5a2   :  { %v1343_v7 = vmul.f32 %v1302_v52, %v1247_v0 }
 0x5a3   :  { %v1354_v1 = vadd.f32 %v1338_v19, %v2447_v5 }
 0x5a4   :  { %v1359_v18 = vadd.f32 %v1343_v7, %v2468_v32  ;;  %v1292_v11 = vpop.permute.xlu1 %1291 }
 0x5a5   :  { %1370 = vst.msk [vmem:[%s2700_s8 + $0x20] sm:$0xff] %vm95_vm0, %v1354_v1  ;;  %v1341_v5 = vmul.f32 %v1292_v11, %v1245_v51  ;;  %v1312_v4 = vpop.permute.xlu0 %1311 }
 0x5a6   :  { %1375 = vst.msk [vmem:[%s2700_s8 + $0x48] sm:$0xff] %vm95_vm0, %v1359_v18  ;;  %v1345_v32 = vmul.f32 %v1312_v4, %v1249_v21 }
 0x5a7   :  { %v1357_v10 = vadd.f32 %v1341_v5, %v2454_v25 }
 0x5a8   :  { %v1361_v29 = vadd.f32 %v1345_v32, %v2482_v38  ;;  %v1287_v27 = vpop.permute.xlu1 %1286 }
 0x5a9   :  { %1373 = vst.msk [vmem:[%s2700_s8 + $0x38] sm:$0xff] %vm95_vm0, %v1357_v10  ;;  %v1340_v25 = vmul.f32 %v1287_v27, %v1244_v63  ;;  %v1322_v31 = vpop.permute.xlu0 %1321 }
 0x5aa   :  { %1377 = vst.msk [vmem:[%s2700_s8 + $0x58] sm:$0xff] %vm95_vm0, %v1361_v29  ;;  %v1347_v38 = vmul.f32 %v1322_v31, %v1251_v23 }
 0x5ab   :  { %v1356_v22 = vadd.f32 %v1340_v25, %v2461_v28 }
 0x5ac   :  { %v1363_v12 = vadd.f32 %v1347_v38, %v2496_v56  ;;  %v1297_v33 = vpop.permute.xlu1 %1296 }
 0x5ad   :  { %1372 = vst.msk [vmem:[%s2700_s8 + $0x30] sm:$0xff] %vm95_vm0, %v1356_v22  ;;  %v1342_v28 = vmul.f32 %v1297_v33, %v1246_v36  ;;  %v1332_v35 = vpop.permute.xlu0 %1331 }
 0x5ae   :  { %1379 = vst.msk [vmem:[%s2700_s8 + $0x68] sm:$0xff] %vm95_vm0, %v1363_v12  ;;  %v1349_v56 = vmul.f32 %v1332_v35, %v1253_v45 }
 0x5af   :  { %v1358_v15 = vadd.f32 %v1342_v28, %v2475_v8 }
 0x5b0   :  { %v1365_v40 = vadd.f32 %v1349_v56, %v2510_v57  ;;  %v1307_v46 = vpop.permute.xlu1 %1306  ;;  %v1250_v57 = vsub.f32 %v1900_v30, %v2503_v62 }
 0x5b1   :  { %1374 = vst.msk [vmem:[%s2700_s8 + $0x40] sm:$0xff] %vm95_vm0, %v1358_v15  ;;  %v1344_v14 = vmul.f32 %v1307_v46, %v1248_v37 }
 0x5b2   :  { %1381 = vst.msk [vmem:[%s2700_s8 + $0x78] sm:$0xff] %vm95_vm0, %v1365_v40 }
 0x5b3   :  { %v1360_v8 = vadd.f32 %v1344_v14, %v2489_v41 }
 0x5b4   :  { %v1317_v50 = vpop.permute.xlu1 %1316 }
 0x5b5   :  { %1376 = vst.msk [vmem:[%s2700_s8 + $0x50] sm:$0xff] %vm95_vm0, %v1360_v8  ;;  %v1346_v53 = vmul.f32 %v1317_v50, %v1250_v57 }
 0x5b7   :  { %v1362_v39 = vadd.f32 %v1346_v53, %v2503_v62 }
 0x5b8   :  { %v1327_v17 = vpop.permute.xlu1 %1326 }
 0x5b9   :  { %1378 = vst.msk [vmem:[%s2700_s8 + $0x60] sm:$0xff] %vm95_vm0, %v1362_v39  ;;  %v1348_v41 = vmul.f32 %v1327_v17, %v1252_v55 }
 0x5bb   :  { %v1364_v47 = vadd.f32 %v1348_v41, %v2522_v26 }
 0x5bd   :  { %1380 = vst.msk [vmem:[%s2700_s8 + $0x70] sm:$0xff] %vm95_vm0, %v1364_v47 }
 0x5be   :  { %1386 = vsyncpa [#allocation4], 1 }

</bundles_post_ra>
